<compile_context>
chip_gen: v5e
topology: v5e:2x2
jax: 0.10.0
libtpu: 0.0.40
codegen_flags: <defaults>
</compile_context>

<pallas_src>
import functools
import math

import jax
import jax.numpy as jnp
from jax.experimental import pallas as pl
from jax.experimental.pallas import tpu as pltpu


# ----------------------------- VMEM sizing (generation-aware) -----------------------------
@functools.lru_cache(maxsize=1)
def _vmem_config():
    """(scoped vmem limit, double-buffered tile budget) derived from the chip."""
    phys = 64 * 1024 * 1024                      # conservative fallback (v7x-sized)
    try:
        phys = int(pltpu.get_tpu_info().vmem_capacity_bytes)
    except Exception:
        pass
    limit = (phys * 3) // 4                      # scoped limit we request from Mosaic
    budget = (phys * 3) // 8                     # tile budget (headroom for temporaries)
    return limit, budget


# ----------------------------- Linear projection kernel -----------------------------
def _linear_kernel(x_ref, w_ref, o_ref):
    # x: (TM, Kin) @ w: (Kin, TN) -> o: (TM, TN); MXU matmul, f32 accumulation.
    o_ref[...] = jnp.dot(
        x_ref[...], w_ref[...], preferred_element_type=jnp.float32
    ).astype(o_ref.dtype)


def _pick_linear_tiles(M, Kin, N, itemsize, budget):
    """Row tile (8-aligned) and N tile (128-aligned) whose double-buffered footprint fits."""
    tm = min(512, M)
    if tm < M:
        tm = max(8, (tm // 8) * 8)
    tn = N

    def footprint(tm_, tn_):
        return 2 * itemsize * (tm_ * Kin + Kin * tn_ + tm_ * tn_)

    # Shrink the weight's N tile first (keeps row tiles big for MXU feed);
    # needed on v7x (64 MiB VMEM) once num_hiddens gets large.
    while footprint(tm, tn) > budget and tn > 128:
        tn = max(128, ((tn // 2) // 128) * 128)
    while footprint(tm, tn) > budget and tm > 8:
        tm = max(8, ((tm // 2) // 8) * 8)
    return tm, min(tn, N)


def linear(x2d, w):
    """(M, Kin) @ (Kin, N) -> (M, N), tiled over rows and (if needed) N columns."""
    M, Kin = x2d.shape
    _, N = w.shape
    limit, budget = _vmem_config()
    tm, tn = _pick_linear_tiles(M, Kin, N, x2d.dtype.itemsize, budget)
    return pl.pallas_call(
        _linear_kernel,
        out_shape=jax.ShapeDtypeStruct((M, N), x2d.dtype),
        grid=(pl.cdiv(M, tm), pl.cdiv(N, tn)),
        in_specs=[
            pl.BlockSpec((tm, Kin), lambda i, j: (i, 0)),
            pl.BlockSpec((Kin, tn), lambda i, j: (0, j)),
        ],
        out_specs=pl.BlockSpec((tm, tn), lambda i, j: (i, j)),
        compiler_params=pltpu.CompilerParams(
            dimension_semantics=("parallel", "parallel"),
            vmem_limit_bytes=limit,
        ),
        cost_estimate=pl.CostEstimate(
            flops=2 * M * Kin * N,
            transcendentals=0,
            bytes_accessed=x2d.dtype.itemsize * (M * Kin + Kin * N + M * N),
        ),
    )(x2d, w)


# ----------------------------- Flash-style masked attention kernel -----------------------------
def _flash_attn_kernel(vlen_ref, q_ref, k_ref, v_ref, o_ref,
                       m_sc, l_sc, acc_sc, *, sm_scale, k_tile):
    # q: (T, Qt, d)   k, v: (T, Kt, d)   vlen: (T, 1) int32   o: (T, Qt, d)
    kv = pl.program_id(2)

    @pl.when(kv == 0)
    def _():
        m_sc[...] = jnp.full(m_sc.shape, -jnp.inf, jnp.float32)
        l_sc[...] = jnp.zeros(l_sc.shape, jnp.float32)
        acc_sc[...] = jnp.zeros(acc_sc.shape, jnp.float32)

    # Batched QK^T contracting on the last dims — K feeds the MXU in its natural
    # layout, operands stay in their native dtype (bf16-native MXU on v6e/v7x),
    # accumulation is f32.  sm_scale is applied on the f32 scores.
    s = jax.lax.dot_general(
        q_ref[...], k_ref[...],
        dimension_numbers=(((2,), (2,)), ((0,), (0,))),
        preferred_element_type=jnp.float32,
    ) * sm_scale                                           # (T, Qt, Kt)

    # masked_softmax semantics: key positions >= valid_len get -1e6 before softmax.
    # Mask is built at (T, 1, Kt) and broadcast over Q (Qt x less iota/compare VPU work).
    # -1e6 (not -inf) also keeps padded / fully-masked rows NaN-free.
    col = jax.lax.broadcasted_iota(jnp.int32, (s.shape[0], 1, s.shape[2]), 2) + kv * k_tile
    vlen = vlen_ref[...][:, :, None]                       # (T, 1, 1)
    s = jnp.where(col < vlen, s, jnp.float32(-1e6))

    # Online softmax accumulation across the K grid axis.
    m_prev = m_sc[...]
    m_new = jnp.maximum(m_prev, jnp.max(s, axis=-1, keepdims=True))
    alpha = jnp.exp(m_prev - m_new)
    p = jnp.exp(s - m_new)
    l_sc[...] = alpha * l_sc[...] + jnp.sum(p, axis=-1, keepdims=True)
    acc_sc[...] = alpha * acc_sc[...] + jax.lax.dot_general(
        p.astype(v_ref.dtype), v_ref[...],
        dimension_numbers=(((2,), (1,)), ((0,), (0,))),
        preferred_element_type=jnp.float32,
    )
    m_sc[...] = m_new

    # TODO(synk): dropout on attention weights intentionally skipped (eval-mode identity).

    @pl.when(kv == pl.num_programs(2) - 1)
    def _():
        # Normalize AFTER the PV matmul: a (T, Qt, d) multiply instead of (T, Qt, Kt).
        inv_l = pl.reciprocal(l_sc[...], approx=False)     # exact; tiny (T, Qt, 1) tensor
        o_ref[...] = (acc_sc[...] * inv_l).astype(o_ref.dtype)


def _pick_attn_tiles(BH, Qlen, Klen, d, itemsize, budget):
    """(bh_tile, q_tile, k_tile) fitting the VMEM budget, with >= ~8 BH grid steps."""
    q_tile = Qlen if Qlen <= 128 else 128
    k_tile = Klen if Klen <= 512 else 512
    if q_tile < Qlen:
        q_tile = max(8, (q_tile // 8) * 8)
    if k_tile < Klen:
        k_tile = max(8, (k_tile // 8) * 8)

    # Per-(batch*head) footprint: double-buffered q/o + k/v blocks, f32 online-softmax
    # scratch (acc, m, l), and ~3x f32 (Qt, Kt) temporaries (scores, p, mask/iota).
    per = (2 * itemsize * (2 * q_tile * d + 2 * k_tile * d)
           + 4 * (q_tile * d + 2 * q_tile)
           + 3 * 4 * q_tile * k_tile)
    bh = max(1, budget // per)
    # Cap so the BH axis has several grid steps (pipelining + v7x 2-TC sharding);
    # Q/K tiling above bounds the footprint even for the small-tile fallback.
    bh = min(bh, BH, max(8, -(-BH // 8)))
    if bh >= BH:
        return BH, q_tile, k_tile
    bh = (bh // 8) * 8 if bh >= 8 else min(8, BH)   # vlen block needs 8-aligned (or full) rows
    return max(1, bh), q_tile, k_tile


def dot_product_attention(q, k, v, valid_lens_rep):
    """q: (BH, Q, d)  k, v: (BH, K, d)  valid_lens_rep: (BH,) int32."""
    BH, Qlen, d = q.shape
    _, Klen, _ = k.shape
    limit, budget = _vmem_config()
    bh_tile, q_tile, k_tile = _pick_attn_tiles(BH, Qlen, Klen, d, q.dtype.itemsize, budget)
    vlen2d = valid_lens_rep.astype(jnp.int32).reshape(BH, 1)
    # TODO(synk): pass valid_lens via scalar prefetch (SMEM) and add a pl.when fast
    # path that skips masking when the whole tile is fully valid.
    kern = functools.partial(_flash_attn_kernel, sm_scale=1.0 / math.sqrt(d), k_tile=k_tile)
    return pl.pallas_call(
        kern,
        out_shape=jax.ShapeDtypeStruct((BH, Qlen, d), q.dtype),
        grid=(pl.cdiv(BH, bh_tile), pl.cdiv(Qlen, q_tile), pl.cdiv(Klen, k_tile)),
        in_specs=[
            pl.BlockSpec((bh_tile, 1), lambda b, qi, ki: (b, 0)),
            pl.BlockSpec((bh_tile, q_tile, d), lambda b, qi, ki: (b, qi, 0)),
            pl.BlockSpec((bh_tile, k_tile, d), lambda b, qi, ki: (b, ki, 0)),
            pl.BlockSpec((bh_tile, k_tile, d), lambda b, qi, ki: (b, ki, 0)),
        ],
        out_specs=pl.BlockSpec((bh_tile, q_tile, d), lambda b, qi, ki: (b, qi, 0)),
        scratch_shapes=[
            pltpu.VMEM((bh_tile, q_tile, 1), jnp.float32),   # m (running max)
            pltpu.VMEM((bh_tile, q_tile, 1), jnp.float32),   # l (running denom)
            pltpu.VMEM((bh_tile, q_tile, d), jnp.float32),   # acc
        ],
        compiler_params=pltpu.CompilerParams(
            dimension_semantics=("parallel", "parallel", "arbitrary"),
            vmem_limit_bytes=limit,
        ),
        cost_estimate=pl.CostEstimate(
            flops=4 * BH * Qlen * Klen * d,
            transcendentals=BH * Qlen * Klen,
            bytes_accessed=q.dtype.itemsize * BH * (2 * Qlen * d + 2 * Klen * d) + 4 * BH,
        ),
    )(vlen2d, q, k, v)


# ----------------------------- Module-level glue (plain JAX) -----------------------------
def transpose_qkv(X, num_heads):
    # (B, S, H) -> (B*heads, S, H/heads)
    B, S, H = X.shape
    X = X.reshape(B, S, num_heads, H // num_heads)
    X = jnp.transpose(X, (0, 2, 1, 3))
    return X.reshape(B * num_heads, S, H // num_heads)


def transpose_output(X, num_heads):
    # (B*heads, S, d) -> (B, S, heads*d)
    BH, S, d = X.shape
    X = X.reshape(BH // num_heads, num_heads, S, d)
    X = jnp.transpose(X, (0, 2, 1, 3))
    return X.reshape(BH // num_heads, S, num_heads * d)


def multi_head_attention(params, queries, keys, values, valid_lens, num_heads):
    B, Qlen, _ = queries.shape
    Klen = keys.shape[1]
    H = params["w_q"].shape[1]

    self_attn = (
        queries is keys and keys is values
        and params["w_q"].shape == params["w_k"].shape == params["w_v"].shape
    )
    if self_attn:
        # Weight-concat projection: the activation is read from HBM once and the
        # output store is lane-dense (3H wide); no activation stacking/copies.
        M = B * Qlen
        w_qkv = jnp.concatenate([params["w_q"], params["w_k"], params["w_v"]], axis=1)
        proj = linear(queries.reshape(M, -1), w_qkv)          # (M, 3H)
        q_p = proj[:, :H].reshape(B, Qlen, H)
        k_p = proj[:, H:2 * H].reshape(B, Qlen, H)
        v_p = proj[:, 2 * H:].reshape(B, Qlen, H)
    else:
        def project(x, w):
            b, s, f = x.shape
            return linear(x.reshape(b * s, f), w).reshape(b, s, H)
        q_p = project(queries, params["w_q"])
        k_p = project(keys, params["w_k"])
        v_p = project(values, params["w_v"])

    # TODO(synk): when head_dim is a multiple of 128, fold transpose_qkv/transpose_output
    # into BlockSpec index_maps (grid over batch x head) and drop these XLA transposes;
    # with small head_dim keep the cheap reshapes.
    q = transpose_qkv(q_p, num_heads)
    k = transpose_qkv(k_p, num_heads)
    v = transpose_qkv(v_p, num_heads)

    # torch.repeat_interleave(valid_lens, num_heads, dim=0)
    # TODO(synk): only 1-D (per-batch) valid_lens supported; 2-D per-query variant omitted.
    if valid_lens is None:
        vlen_rep = jnp.full((B * num_heads,), Klen, dtype=jnp.int32)
    else:
        vlen_rep = jnp.repeat(valid_lens.astype(jnp.int32), num_heads, axis=0)

    # TODO(synk): attention output last dim is head_dim (<128) -> masked stores; a
    # layout writing all heads of a batch contiguously would be lane-dense.
    out = dot_product_attention(q, k, v, vlen_rep)            # (B*heads, Q, d)
    out_concat = transpose_output(out, num_heads)             # (B, Q, H)
    return linear(out_concat.reshape(B * Qlen, H), params["w_o"]).reshape(B, Qlen, H)


# ----------------------------- Pure-JAX reference for validation -----------------------------
def reference(params, queries, keys, values, valid_lens, num_heads):
    q = transpose_qkv(queries @ params["w_q"], num_heads)
    k = transpose_qkv(keys @ params["w_k"], num_heads)
    v = transpose_qkv(values @ params["w_v"], num_heads)
    d = q.shape[-1]
    scores = jnp.einsum("bqd,bkd->bqk", q, k) / math.sqrt(d)
    if valid_lens is None:
        vlen = jnp.full((q.shape[0],), k.shape[1], dtype=jnp.int32)
    else:
        vlen = jnp.repeat(valid_lens.astype(jnp.int32), num_heads, axis=0)
    col = jnp.arange(scores.shape[-1])[None, None, :]
    scores = jnp.where(col < vlen[:, None, None], scores, -1e6)
    p = jax.nn.softmax(scores, axis=-1)
    out = jnp.einsum("bqk,bkd->bqd", p, v)
    out = transpose_output(out, num_heads)
    return out @ params["w_o"]


if __name__ == "__main__":
    # Small synthetic config (matches the module's expected shapes).
    batch = 2
    q_len = 8
    kv_len = 8
    query_size = key_size = value_size = 24
    num_hiddens = 32
    num_heads = 4

    key = jax.random.PRNGKey(0)
    ks = jax.random.split(key, 8)

    # Parameters stored as (in, out) so x @ W matches PyTorch's x @ W_linear.T (bias=False).
    scale = 0.1
    params = {
        "w_q": scale * jax.random.normal(ks[0], (query_size, num_hiddens), jnp.float32),
        "w_k": scale * jax.random.normal(ks[1], (key_size, num_hiddens), jnp.float32),
        "w_v": scale * jax.random.normal(ks[2], (value_size, num_hiddens), jnp.float32),
        "w_o": scale * jax.random.normal(ks[3], (num_hiddens, num_hiddens), jnp.float32),
    }

    queries = jax.random.normal(ks[4], (batch, q_len, query_size), jnp.float32)
    keys_in = jax.random.normal(ks[5], (batch, kv_len, key_size), jnp.float32)
    values = jax.random.normal(ks[6], (batch, kv_len, value_size), jnp.float32)
    valid_lens = jnp.array([3, 6], dtype=jnp.int32)  # per-batch valid lengths

    # Cross-attention path (separate projections).
    out = multi_head_attention(params, queries, keys_in, values, valid_lens, num_heads)
    out = jax.block_until_ready(out)
    ref = reference(params, queries, keys_in, values, valid_lens, num_heads)
    assert out.shape == (batch, q_len, num_hiddens)
    assert jnp.allclose(out, ref, atol=5e-3, rtol=5e-3), "cross-attn mismatch vs reference"

    # Self-attention path (fused weight-concat QKV projection).
    out_s = multi_head_attention(params, queries, queries, queries, valid_lens, num_heads)
    out_s = jax.block_until_ready(out_s)
    ref_s = reference(params, queries, queries, queries, valid_lens, num_heads)
    assert jnp.allclose(out_s, ref_s, atol=5e-3, rtol=5e-3), "self-attn mismatch vs reference"

    print("KERNEL_OK")
</pallas_src>

<mosaic_0001>
module attributes {stable_mosaic.version = 11 : i64} {
  func.func @_linear_kernel(%arg0: i32, %arg1: i32, %arg2: memref<16x24xf32, #tpu.memory_space<vmem>>, %arg3: memref<24x32xf32, #tpu.memory_space<vmem>>, %arg4: memref<16x32xf32, #tpu.memory_space<vmem>>) attributes {dimension_semantics = [#tpu.dimension_semantics<parallel>, #tpu.dimension_semantics<parallel>], iteration_bounds = array<i64: 1, 1>, scalar_prefetch = 0 : i64, scratch_operands = 0 : i64, tpu.core_type = #tpu.core_type<tc>, window_params = [{transform_indices = @transform_0, window_bounds = array<i64: 16, 24>}, {transform_indices = @transform_1, window_bounds = array<i64: 24, 32>}, {transform_indices = @transform_2, window_bounds = array<i64: 16, 32>}]} {
    %c0 = arith.constant 0 : index
    %c0_0 = arith.constant 0 : index
    %0 = vector.load %arg2[%c0, %c0_0] : memref<16x24xf32, #tpu.memory_space<vmem>>, vector<16x24xf32>
    %c0_1 = arith.constant 0 : index
    %c0_2 = arith.constant 0 : index
    %1 = vector.load %arg3[%c0_1, %c0_2] : memref<24x32xf32, #tpu.memory_space<vmem>>, vector<24x32xf32>
    %cst = arith.constant dense<0.000000e+00> : vector<16x32xf32>
    %2 = tpu.matmul %0, %1, %cst {dimension_numbers = #tpu.dot_dimension_numbers<[1], [0], [0], [1], [0, 0, 1, 1], [], []>} : vector<16x24xf32>, vector<24x32xf32>, vector<16x32xf32> -> vector<16x32xf32>
    %c0_3 = arith.constant 0 : index
    %c0_4 = arith.constant 0 : index
    %3 = vector.load %arg4[%c0_3, %c0_4] : memref<16x32xf32, #tpu.memory_space<vmem>>, vector<16x32xf32>
    tpu.vector_store %arg4[%c0_3, %c0_4], %2 {strides = array<i32>} : memref<16x32xf32, #tpu.memory_space<vmem>>, vector<16x32xf32>,
    return
  }
  func.func @transform_0(%arg0: i32, %arg1: i32) -> (i32, i32) {
    %c0_i32 = arith.constant 0 : i32
    %c0_i32_0 = arith.constant 0 : i32
    return %arg0, %c0_i32 : i32, i32
  }
  func.func @transform_1(%arg0: i32, %arg1: i32) -> (i32, i32) {
    %c0_i32 = arith.constant 0 : i32
    %c0_i32_0 = arith.constant 0 : i32
    return %c0_i32, %arg1 : i32, i32
  }
  func.func @transform_2(%arg0: i32, %arg1: i32) -> (i32, i32) {
    %c0_i32 = arith.constant 0 : i32
    return %arg0, %arg1 : i32, i32
  }
}

</mosaic_0001>

<bundles_post_ra>
// kernel: tpu_custom_call.1
= control target key start
LH: loop header
LB: loop body
LE: loop exit
PB: predicated region body
PF: predicated region fallthrough
CT: control target
= control target key end

     0   :  { %7 = vsyncpa [#allocation3], 0  ;;  %s228_s0 = inlined_call_operand.hbm [shape: f32[16,24], index: 0, kind: input, shape index: {}]   ;;  %s229_s1 = inlined_call_operand.hbm [shape: f32[24,32], index: 1, kind: input, shape index: {}]   ;;  %s230_s2 = inlined_call_operand.hbm [shape: f32[16,32], index: 2, kind: output, shape index: {}]  }
   0x1   :  { %8 = vsyncpa [#allocation6], 0 }
   0x2   :  { %9 = vsyncpa [#allocation4], 0  ;;  %s14_s11 = sshll.u32 %s228_s0, 4  ;;  %s190_s12 = smov [#allocation2]   ;;  %s15_s11 = int_to_ptr.hbm [resolvable:$true] %s14_s11 }
   0x3   :  { %s16_s13 = sshll.u32 %s190_s12, 4  ;;  %s27_s16 = sshll.u32 %s229_s1, 4  ;;  %s17_s13 = int_to_ptr.vmem [resolvable:$true] %s16_s13  ;;  %s28_s16 = int_to_ptr.hbm [resolvable:$true] %s27_s16 }
   0x4   :  { %s191_s17 = smov 128   ;;  %s192_s18 = smov 8  }
   0x5   :  { %22 = dma.hbm_to_vmem [thread:$0]  %s15_s11, 256, %s17_s13, [#allocation3], %s191_s17, %s191_s17, %s192_s18  }
   0x6   :  { %s193_s19 = smov [#allocation5]  }
   0x7   :  { %s29_s20 = sshll.u32 %s193_s19, 4  ;;  %s30_s20 = int_to_ptr.vmem [resolvable:$true] %s29_s20 }
   0x8   :  { %35 = dma.hbm_to_vmem [thread:$0]  %s28_s16, 384, %s30_s20, [#allocation6], %s191_s17, %s191_s17, %s192_s18  }
   0x9   :  { %184 = dma.done.wait [#allocation3], 256  }
   0xa   :  { %185 = vsyncadd [#allocation3], 4294967040 }
   0xb   :  { %186 = dma.done.wait [#allocation6], 384  }
   0xc   :  { %187 = vsyncadd [#allocation6], 4294966912  ;;  %v48_v0 = vld [vmem:[#allocation5 + $0x10] sm:$0xff]  ;;  %v47_v1 = vld [vmem:[#allocation5 + $0x8] sm:$0xff]  ;;  %vm49_vm0 = vcmask 195584   ;;  %s194_s0 = smov [#allocation7]  }
   0xd   :  { %69 = vmatpush.msra.mxu0 %v48_v0  ;;  %104 = vmatpush.msra.mxu1 %v48_v0  ;;  %v46_v2 = vld [vmem:[#allocation5] sm:$0xff]  ;;  %v44_v3 = vld [vmem:[#allocation2] sm:$0xff]  ;;  %v45_v4 = vld [vmem:[#allocation2 + $0x8] sm:$0xff]  ;;  %s86_s1 = sshll.u32 %s194_s0, 4  ;;  %s88_s23 = sshll.u32 %s230_s2, 4  ;;  %vm79_vm1 = vcmask 261120   ;;  %s87_s1 = int_to_ptr.vmem [resolvable:$true] %s86_s1  ;;  %s89_s23 = int_to_ptr.hbm [resolvable:$true] %s88_s23 }
   0xf   :  { %70 = vmatpush.msra.mxu0 %v47_v1  ;;  %105 = vmatpush.msra.mxu1 %v47_v1 }
  0x11   :  { %71 = vmatpush.msra.mxu0 %v46_v2  ;;  %106 = vmatpush.msra.mxu1 %v46_v2 }
  0x12   :  { %102 = vmatmul.msk.f32.vlgmr.msra.gmra.mxu0 %vm49_vm0, %v44_v3  ;;  %103 = vmatmul.msk.f32.vlgmr.msra.gmra.mxu1 %vm49_vm0, %v45_v4 }
  0x8f   :  { %v73_v5 = vpop.f32.mrf.mxu0  ;;  %v76_v6 = vpop.f32.mrf.mxu1 }
  0x90   :  { %80 = vst.msk [vmem:[#allocation7] sm:$0xff] %vm79_vm1, %v73_v5 }
  0x91   :  { %81 = vst.msk [vmem:[#allocation7 + $0x8] sm:$0xff] %vm79_vm1, %v76_v6 }
  0x92   :  { %94 = dma.vmem_to_hbm [thread:$0]  %s87_s1, 256, %s89_s23, [#allocation4], %s191_s17, %s191_s17, %s192_s18  }
  0x93   :  { %188 = dma.done.wait [#allocation4], 256  }
  0x94   :  { %189 = vsyncadd [#allocation4], 4294967040 }
  0x95   :  { %99 = vsyncpa [#allocation3], 1 }
  0x96   :  { %100 = vsyncpa [#allocation6], 1 }
  0x97   :  { %101 = vsyncpa [#allocation4], 1 }

</bundles_post_ra>
